<compile_context>
chip_gen: v6e
topology: v6e:2x2x1
jax: 0.10.0
libtpu: 0.0.40
codegen_flags: <defaults>
</compile_context>

<pallas_src>
import math
import jax
import jax.numpy as jnp
from jax.experimental import pallas as pl
from jax.experimental.pallas import tpu as pltpu

NUM_INPUTS = 4   # CartPole-v1 observation_space.shape[0]
HIDDEN = 64


def _round_up(x, m):
    return ((x + m - 1) // m) * m


def _default_compute_dtype():
    """bf16 activations on v6e/v7x (bf16 VPU/EUP), f32 elsewhere (v5e etc.)."""
    try:
        kind = jax.devices()[0].device_kind.lower().replace(" ", "")
    except Exception:
        return jnp.float32
    if any(tag in kind for tag in ("v6", "v7", "tpu6", "tpu7")):
        return jnp.bfloat16
    return jnp.float32


def _value_kernel(x_ref, w1_ref, b1_ref, w2_ref, b2_ref,
                  w3_ref, b3_ref, w4_ref, b4_ref, o_ref):
    """Feature-major MLP tile: x_ref is (NUM_INPUTS, TB), o_ref is (1, TB)."""
    cdt = w1_ref.dtype
    x = x_ref[...].astype(cdt)                # (K, TB), lane-dense
    w1 = w1_ref[...]                          # (H, K)

    # ---- Layer 1: Linear(K -> H) + SiLU -------------------------------------
    # K is tiny (4): do K broadcast FMAs on the VPU instead of pushing an
    # almost-empty contraction through the MXU.
    num_in = w1.shape[1]
    h = w1[:, 0:1] * x[0:1, :]                # (H, TB)
    for k in range(1, num_in):                # static unrolled loop
        h = h + w1[:, k:k + 1] * x[k:k + 1, :]
    h = h + b1_ref[...]                       # (H, 1) broadcasts along lanes
    h = h * jax.nn.sigmoid(h)                 # SiLU

    # ---- Layer 2: Linear(H -> H) + Tanh (MXU, f32 accumulate) ---------------
    z = jnp.dot(w2_ref[...], h, preferred_element_type=jnp.float32)
    h = jnp.tanh(z.astype(cdt) + b2_ref[...])

    # ---- Layer 3: Linear(H -> H) + Tanh --------------------------------------
    z = jnp.dot(w3_ref[...], h, preferred_element_type=jnp.float32)
    h = jnp.tanh(z.astype(cdt) + b3_ref[...])

    # ---- Layer 4: Linear(H -> 1) -> lane-dense (1, TB) output row -----------
    z = jnp.dot(w4_ref[...], h, preferred_element_type=jnp.float32)  # (1, TB)
    o_ref[...] = (z + b4_ref[0, 0]).astype(o_ref.dtype)


def value_forward(s_t, params, *, tb=512, compute_dtype=None):
    """s_t: (B, NUM_INPUTS) f32 -> (B, 1) f32 state values."""
    w1, b1, w2, b2, w3, b3, w4, b4 = params
    B, K = s_t.shape
    H = w1.shape[0]

    if compute_dtype is None:
        compute_dtype = _default_compute_dtype()
    cdt = compute_dtype

    # Batch tile: multiple of 128 so both the (K, TB) input block and the
    # (1, TB) output block are lane-dense; capped so VMEM stays tiny even on
    # v7x's 64 MiB.
    tb = max(128, min(_round_up(tb, 128), _round_up(B, 128)))
    num_tiles = pl.cdiv(B, tb)
    b_pad = num_tiles * tb

    # Feature-major input slab (K, B_pad); padded rows compute garbage that is
    # sliced off below (per-row independence is preserved).
    x_t = jnp.pad(s_t, ((0, b_pad - B), (0, 0))).T.astype(jnp.float32)

    # Weights/biases in compute dtype (bf16 on v6e/v7x, f32 on v5e).
    w1c, b1c = w1.astype(cdt), b1.astype(cdt)
    w2c, b2c = w2.astype(cdt), b2.astype(cdt)
    w3c, b3c = w3.astype(cdt), b3.astype(cdt)
    w4c = w4.astype(cdt)
    b4c = b4.reshape(1, 1).astype(jnp.float32)     # scalar bias -> SMEM

    resident = lambda shape: pl.BlockSpec(shape, lambda i: (0, 0))

    out = pl.pallas_call(
        _value_kernel,
        out_shape=jax.ShapeDtypeStruct((1, b_pad), jnp.float32),
        grid=(num_tiles,),
        in_specs=[
            pl.BlockSpec((K, tb), lambda i: (0, i)),       # x^T batch tile
            resident((H, K)), resident((H, 1)),            # w1, b1 (VMEM-resident)
            resident((H, H)), resident((H, 1)),            # w2, b2
            resident((H, H)), resident((H, 1)),            # w3, b3
            resident((1, H)),                              # w4
            pl.BlockSpec(memory_space=pltpu.MemorySpace.SMEM),   # b4 scalar
        ],
        out_specs=pl.BlockSpec((1, tb), lambda i: (0, i)),
        compiler_params=pltpu.CompilerParams(
            dimension_semantics=("parallel",),             # megacore on v7x
            vmem_limit_bytes=32 << 20,
        ),
    )(x_t, w1c, b1c, w2c, b2c, w3c, b3c, w4c, b4c)

    # (1, B_pad) -> (B, 1); drop padded rows.
    return out.reshape(b_pad, 1)[:B]


def init_params(key):
    """torch.nn.Linear default init, weights stored (out_features, in_features)."""
    def linear(key, fan_in, fan_out):
        kw, kb = jax.random.split(key)
        bound = 1.0 / math.sqrt(fan_in)
        w = jax.random.uniform(kw, (fan_out, fan_in), jnp.float32, -bound, bound)
        b = jax.random.uniform(kb, (fan_out, 1), jnp.float32, -bound, bound)
        return w, b

    k1, k2, k3, k4 = jax.random.split(key, 4)
    w1, b1 = linear(k1, NUM_INPUTS, HIDDEN)
    w2, b2 = linear(k2, HIDDEN, HIDDEN)
    w3, b3 = linear(k3, HIDDEN, HIDDEN)
    w4, b4 = linear(k4, HIDDEN, 1)
    return (w1, b1, w2, b2, w3, b3, w4, b4)


def _value_reference(s_t, params):
    """Plain-JAX f32 reference with torch semantics (y = x @ W^T + b)."""
    w1, b1, w2, b2, w3, b3, w4, b4 = params
    h = s_t @ w1.T + b1.T
    h = h * jax.nn.sigmoid(h)
    h = jnp.tanh(h @ w2.T + b2.T)
    h = jnp.tanh(h @ w3.T + b3.T)
    return h @ w4.T + b4.T


if __name__ == "__main__":
    key = jax.random.PRNGKey(0)
    k_params, k_x1, k_x2 = jax.random.split(key, 3)

    params = init_params(k_params)
    cdt = _default_compute_dtype()
    tol = 1e-5 if cdt == jnp.float32 else 5e-2

    # Small batch (single grid tile).
    s_small = jax.random.normal(k_x1, (8, NUM_INPUTS), jnp.float32)
    out_small = value_forward(s_small, params, compute_dtype=cdt)
    jax.block_until_ready(out_small)
    ref_small = _value_reference(s_small, params)
    assert out_small.shape == (8, 1)
    assert jnp.allclose(out_small, ref_small, atol=tol, rtol=tol)

    # Larger batch exercising multiple grid tiles + ragged padding.
    s_big = jax.random.normal(k_x2, (600, NUM_INPUTS), jnp.float32)
    out_big = value_forward(s_big, params, compute_dtype=cdt)
    jax.block_until_ready(out_big)
    ref_big = _value_reference(s_big, params)
    assert out_big.shape == (600, 1)
    assert jnp.allclose(out_big, ref_big, atol=tol, rtol=tol)

    print("KERNEL_OK")
</pallas_src>

<mosaic_0001>
module attributes {stable_mosaic.version = 11 : i64} {
  func.func @_value_kernel(%arg0: i32, %arg1: memref<4x128xf32, #tpu.memory_space<vmem>>, %arg2: memref<64x4xf32, #tpu.memory_space<vmem>>, %arg3: memref<64x1xf32, #tpu.memory_space<vmem>>, %arg4: memref<64x64xf32, #tpu.memory_space<vmem>>, %arg5: memref<64x1xf32, #tpu.memory_space<vmem>>, %arg6: memref<64x64xf32, #tpu.memory_space<vmem>>, %arg7: memref<64x1xf32, #tpu.memory_space<vmem>>, %arg8: memref<1x64xf32, #tpu.memory_space<vmem>>, %arg9: memref<1x1xf32, #tpu.memory_space<smem>>, %arg10: memref<1x128xf32, #tpu.memory_space<vmem>>) attributes {dimension_semantics = [#tpu.dimension_semantics<parallel>], iteration_bounds = array<i64: 1>, scalar_prefetch = 0 : i64, scratch_operands = 0 : i64, tpu.core_type = #tpu.core_type<tc>, window_params = [{transform_indices = @transform_0, window_bounds = array<i64: 4, 128>}, {pipeline_mode = #tpu.pipeline_mode<synchronous>, transform_indices = @transform_1, window_bounds = array<i64: 64, 4>}, {pipeline_mode = #tpu.pipeline_mode<synchronous>, transform_indices = @transform_2, window_bounds = array<i64: 64, 1>}, {pipeline_mode = #tpu.pipeline_mode<synchronous>, transform_indices = @transform_3, window_bounds = array<i64: 64, 64>}, {pipeline_mode = #tpu.pipeline_mode<synchronous>, transform_indices = @transform_4, window_bounds = array<i64: 64, 1>}, {pipeline_mode = #tpu.pipeline_mode<synchronous>, transform_indices = @transform_5, window_bounds = array<i64: 64, 64>}, {pipeline_mode = #tpu.pipeline_mode<synchronous>, transform_indices = @transform_6, window_bounds = array<i64: 64, 1>}, {pipeline_mode = #tpu.pipeline_mode<synchronous>, transform_indices = @transform_7, window_bounds = array<i64: 1, 64>}, {transform_indices = @transform_8, window_bounds = array<i64: 1, 1>}, {transform_indices = @transform_9, window_bounds = array<i64: 1, 128>}]} {
    %c0 = arith.constant 0 : index
    %c0_0 = arith.constant 0 : index
    %0 = vector.load %arg1[%c0, %c0_0] : memref<4x128xf32, #tpu.memory_space<vmem>>, vector<4x128xf32>
    %c0_1 = arith.constant 0 : index
    %c0_2 = arith.constant 0 : index
    %1 = vector.load %arg2[%c0_1, %c0_2] : memref<64x4xf32, #tpu.memory_space<vmem>>, vector<64x4xf32>
    %2 = vector.extract_strided_slice %1 {offsets = [0, 0], sizes = [64, 1], strides = [1, 1]} : vector<64x4xf32> to vector<64x1xf32>
    %3 = vector.extract_strided_slice %0 {offsets = [0, 0], sizes = [1, 128], strides = [1, 1]} : vector<4x128xf32> to vector<1x128xf32>
    %4 = vector.broadcast %2 : vector<64x1xf32> to vector<64x128xf32>
    %5 = vector.broadcast %3 : vector<1x128xf32> to vector<64x128xf32>
    %6 = arith.mulf %4, %5 : vector<64x128xf32>
    %7 = vector.extract_strided_slice %1 {offsets = [0, 1], sizes = [64, 1], strides = [1, 1]} : vector<64x4xf32> to vector<64x1xf32>
    %8 = vector.extract_strided_slice %0 {offsets = [1, 0], sizes = [1, 128], strides = [1, 1]} : vector<4x128xf32> to vector<1x128xf32>
    %9 = vector.broadcast %7 : vector<64x1xf32> to vector<64x128xf32>
    %10 = vector.broadcast %8 : vector<1x128xf32> to vector<64x128xf32>
    %11 = arith.mulf %9, %10 : vector<64x128xf32>
    %12 = arith.addf %6, %11 : vector<64x128xf32>
    %13 = vector.extract_strided_slice %1 {offsets = [0, 2], sizes = [64, 1], strides = [1, 1]} : vector<64x4xf32> to vector<64x1xf32>
    %14 = vector.extract_strided_slice %0 {offsets = [2, 0], sizes = [1, 128], strides = [1, 1]} : vector<4x128xf32> to vector<1x128xf32>
    %15 = vector.broadcast %13 : vector<64x1xf32> to vector<64x128xf32>
    %16 = vector.broadcast %14 : vector<1x128xf32> to vector<64x128xf32>
    %17 = arith.mulf %15, %16 : vector<64x128xf32>
    %18 = arith.addf %12, %17 : vector<64x128xf32>
    %19 = vector.extract_strided_slice %1 {offsets = [0, 3], sizes = [64, 1], strides = [1, 1]} : vector<64x4xf32> to vector<64x1xf32>
    %20 = vector.extract_strided_slice %0 {offsets = [3, 0], sizes = [1, 128], strides = [1, 1]} : vector<4x128xf32> to vector<1x128xf32>
    %21 = vector.broadcast %19 : vector<64x1xf32> to vector<64x128xf32>
    %22 = vector.broadcast %20 : vector<1x128xf32> to vector<64x128xf32>
    %23 = arith.mulf %21, %22 : vector<64x128xf32>
    %24 = arith.addf %18, %23 : vector<64x128xf32>
    %c0_3 = arith.constant 0 : index
    %c0_4 = arith.constant 0 : index
    %25 = vector.load %arg3[%c0_3, %c0_4] : memref<64x1xf32, #tpu.memory_space<vmem>>, vector<64x1xf32>
    %26 = vector.broadcast %25 : vector<64x1xf32> to vector<64x128xf32>
    %27 = arith.addf %24, %26 : vector<64x128xf32>
    %28 = arith.negf %27 : vector<64x128xf32>
    %29 = math.exp %28 : vector<64x128xf32>
    %cst = arith.constant 1.000000e+00 : f32
    %30 = vector.broadcast %cst : f32 to vector<64x128xf32>
    %31 = arith.addf %30, %29 : vector<64x128xf32>
    %32 = arith.divf %30, %31 : vector<64x128xf32>
    %33 = arith.mulf %27, %32 : vector<64x128xf32>
    %c0_5 = arith.constant 0 : index
    %c0_6 = arith.constant 0 : index
    %34 = vector.load %arg4[%c0_5, %c0_6] : memref<64x64xf32, #tpu.memory_space<vmem>>, vector<64x64xf32>
    %cst_7 = arith.constant dense<0.000000e+00> : vector<64x128xf32>
    %35 = tpu.matmul %34, %33, %cst_7 {dimension_numbers = #tpu.dot_dimension_numbers<[1], [0], [0], [1], [0, 0, 1, 1], [], []>} : vector<64x64xf32>, vector<64x128xf32>, vector<64x128xf32> -> vector<64x128xf32>
    %c0_8 = arith.constant 0 : index
    %c0_9 = arith.constant 0 : index
    %36 = vector.load %arg5[%c0_8, %c0_9] : memref<64x1xf32, #tpu.memory_space<vmem>>, vector<64x1xf32>
    %37 = vector.broadcast %36 : vector<64x1xf32> to vector<64x128xf32>
    %38 = arith.addf %35, %37 : vector<64x128xf32>
    %39 = math.tanh %38 : vector<64x128xf32>
    %c0_10 = arith.constant 0 : index
    %c0_11 = arith.constant 0 : index
    %40 = vector.load %arg6[%c0_10, %c0_11] : memref<64x64xf32, #tpu.memory_space<vmem>>, vector<64x64xf32>
    %cst_12 = arith.constant dense<0.000000e+00> : vector<64x128xf32>
    %41 = tpu.matmul %40, %39, %cst_12 {dimension_numbers = #tpu.dot_dimension_numbers<[1], [0], [0], [1], [0, 0, 1, 1], [], []>} : vector<64x64xf32>, vector<64x128xf32>, vector<64x128xf32> -> vector<64x128xf32>
    %c0_13 = arith.constant 0 : index
    %c0_14 = arith.constant 0 : index
    %42 = vector.load %arg7[%c0_13, %c0_14] : memref<64x1xf32, #tpu.memory_space<vmem>>, vector<64x1xf32>
    %43 = vector.broadcast %42 : vector<64x1xf32> to vector<64x128xf32>
    %44 = arith.addf %41, %43 : vector<64x128xf32>
    %45 = math.tanh %44 : vector<64x128xf32>
    %c0_15 = arith.constant 0 : index
    %c0_16 = arith.constant 0 : index
    %46 = vector.load %arg8[%c0_15, %c0_16] : memref<1x64xf32, #tpu.memory_space<vmem>>, vector<1x64xf32>
    %cst_17 = arith.constant dense<0.000000e+00> : vector<1x128xf32>
    %47 = tpu.matmul %46, %45, %cst_17 {dimension_numbers = #tpu.dot_dimension_numbers<[1], [0], [0], [1], [0, 0, 1, 1], [], []>} : vector<1x64xf32>, vector<64x128xf32>, vector<1x128xf32> -> vector<1x128xf32>
    %c0_18 = arith.constant 0 : index
    %c0_19 = arith.constant 0 : index
    %48 = memref.load %arg9[%c0_18, %c0_19] : memref<1x1xf32, #tpu.memory_space<smem>>
    %49 = vector.broadcast %48 : f32 to vector<1x128xf32>
    %50 = arith.addf %47, %49 : vector<1x128xf32>
    %c0_20 = arith.constant 0 : index
    %c0_21 = arith.constant 0 : index
    %51 = vector.load %arg10[%c0_20, %c0_21] : memref<1x128xf32, #tpu.memory_space<vmem>>, vector<1x128xf32>
    tpu.vector_store %arg10[%c0_20, %c0_21], %50 {strides = array<i32>} : memref<1x128xf32, #tpu.memory_space<vmem>>, vector<1x128xf32>,
    return
  }
  func.func @transform_0(%arg0: i32) -> (i32, i32) {
    %c0_i32 = arith.constant 0 : i32
    %c0_i32_0 = arith.constant 0 : i32
    return %c0_i32, %arg0 : i32, i32
  }
  func.func @transform_1(%arg0: i32) -> (i32, i32) {
    %c0_i32 = arith.constant 0 : i32
    %c0_i32_0 = arith.constant 0 : i32
    %c0_i32_1 = arith.constant 0 : i32
    return %c0_i32, %c0_i32_0 : i32, i32
  }
  func.func @transform_2(%arg0: i32) -> (i32, i32) {
    %c0_i32 = arith.constant 0 : i32
    %c0_i32_0 = arith.constant 0 : i32
    %c0_i32_1 = arith.constant 0 : i32
    return %c0_i32, %c0_i32_0 : i32, i32
  }
  func.func @transform_3(%arg0: i32) -> (i32, i32) {
    %c0_i32 = arith.constant 0 : i32
    %c0_i32_0 = arith.constant 0 : i32
    %c0_i32_1 = arith.constant 0 : i32
    return %c0_i32, %c0_i32_0 : i32, i32
  }
  func.func @transform_4(%arg0: i32) -> (i32, i32) {
    %c0_i32 = arith.constant 0 : i32
    %c0_i32_0 = arith.constant 0 : i32
    %c0_i32_1 = arith.constant 0 : i32
    return %c0_i32, %c0_i32_0 : i32, i32
  }
  func.func @transform_5(%arg0: i32) -> (i32, i32) {
    %c0_i32 = arith.constant 0 : i32
    %c0_i32_0 = arith.constant 0 : i32
    %c0_i32_1 = arith.constant 0 : i32
    return %c0_i32, %c0_i32_0 : i32, i32
  }
  func.func @transform_6(%arg0: i32) -> (i32, i32) {
    %c0_i32 = arith.constant 0 : i32
    %c0_i32_0 = arith.constant 0 : i32
    %c0_i32_1 = arith.constant 0 : i32
    return %c0_i32, %c0_i32_0 : i32, i32
  }
  func.func @transform_7(%arg0: i32) -> (i32, i32) {
    %c0_i32 = arith.constant 0 : i32
    %c0_i32_0 = arith.constant 0 : i32
    %c0_i32_1 = arith.constant 0 : i32
    return %c0_i32, %c0_i32_0 : i32, i32
  }
  func.func @transform_8(%arg0: i32) -> (i32, i32) {
    %c0_i32 = arith.constant 0 : i32
    %c0_i32_0 = arith.constant 0 : i32
    %c0_i32_1 = arith.constant 0 : i32
    return %c0_i32, %c0_i32_0 : i32, i32
  }
  func.func @transform_9(%arg0: i32) -> (i32, i32) {
    %c0_i32 = arith.constant 0 : i32
    %c0_i32_0 = arith.constant 0 : i32
    return %c0_i32, %arg0 : i32, i32
  }
}

</mosaic_0001>

<bundles_post_ra>
// kernel: tpu_custom_call.1
= control target key start
LH: loop header
LB: loop body
LE: loop exit
PB: predicated region body
PF: predicated region fallthrough
CT: control target
= control target key end

     0   :  { %v1102_v2 = vmov 2   ;;  %v1103_v3 = vmov 0   ;;  %v1104_v5 = vmov 1   ;;  %s1431_s0 = inlined_call_operand.vmem [shape: f32[4,128], index: 0, kind: input, shape index: {}]   ;;  %s1432_s1 = inlined_call_operand.vmem [shape: f32[64,4], index: 1, kind: input, shape index: {}]   ;;  %s1433_s2 = inlined_call_operand.vmem [shape: f32[64,1], index: 2, kind: input, shape index: {}]   ;;  %s1434_s3 = inlined_call_operand.vmem [shape: f32[64,64], index: 3, kind: input, shape index: {}]   ;;  %s1435_s4 = inlined_call_operand.vmem [shape: f32[64,1], index: 4, kind: input, shape index: {}]   ;;  %s1436_s5 = inlined_call_operand.vmem [shape: f32[64,64], index: 5, kind: input, shape index: {}]   ;;  %s1437_s6 = inlined_call_operand.vmem [shape: f32[64,1], index: 6, kind: input, shape index: {}]   ;;  %s1438_s7 = inlined_call_operand.vmem [shape: f32[1,64], index: 7, kind: input, shape index: {}]   ;;  %s1439_s8 = inlined_call_operand.<no memory space> [shape: f32[1,1], index: 8, kind: input, shape index: {}]   ;;  %s1440_s9 = inlined_call_operand.hbm [shape: f32[1,128], index: 9, kind: output, shape index: {}]  }
   0x1   :  { %v41_v0 = vld [vmem:[%s1432_s1 + $0x30] sm:$0xff]  ;;  %v40_v1 = vld [vmem:[%s1432_s1 + $0x28] sm:$0xff]  ;;  %996 = vset.pattern.permute.xlu0 %v1102_v2  ;;  %989 = vset.pattern.permute.xlu1 %v1103_v3  ;;  %v38_v4 = vld [vmem:[%s1432_s1 + $0x18] sm:$0xff] }
   0x2   :  { %75 = vperm.xlu1 %989, %v41_v0   ;;  %168 = vperm.xlu0 %996, %v40_v1   ;;  %v42_v6 = vld [vmem:[%s1432_s1 + $0x38] sm:$0xff] }
   0x6   :  { %990 = vset.pattern.permute.xlu1 %v1104_v5  ;;  %160 = vperm.xlu0 %996, %v38_v4  }
   0x7   :  { %120 = vperm.xlu1 %990, %v41_v0  }
   0x8   :  { %15 = vsyncpa [#allocation4], 0  ;;  %v1105_v7 = vmov 3   ;;  %v39_v8 = vld [vmem:[%s1432_s1 + $0x20] sm:$0xff]  ;;  %v258_v10 = vld [vmem:[%s1433_s2 + $0x38] sm:$0xff]  ;;  %v83_v42 = vlaneseq  ;;  %vm419_vm0 = vcmask 523264  }
   0x9   :  { %v1185_v9 = vld [vmem:[%s1432_s1] sm:$0xff]  ;;  %v36_v11 = vld [vmem:[%s1432_s1 + $0x8] sm:$0xff]  ;;  %v254_v13 = vld [vmem:[%s1433_s2 + $0x18] sm:$0xff]  ;;  %vm1107_vm1 = vmmov 0   ;;  %s1108_s14 = smov [#allocation3]  }
   0xa   :  { %1003 = vset.pattern.permute.xlu0 %v1105_v7  ;;  %v255_v12 = vld [vmem:[%s1433_s2 + $0x20] sm:$0xff]  ;;  %v37_v14 = vld [vmem:[%s1432_s1 + $0x10] sm:$0xff]  ;;  %v256_v24 = vld [vmem:[%s1433_s2 + $0x28] sm:$0xff]  ;;  %v84_v46 = vshrl.u32 %v83_v42, 7  ;;  %s833_s15 = sshll.u32 %s1108_s14, 4  ;;  %s834_s15 = int_to_ptr.vmem [resolvable:$true] %s833_s15 }
   0xb   :  { %991 = vset.pattern.permute.xlu1 %v1102_v2  ;;  %228 = vperm.xlu0 %1003, %v42_v6   ;;  %v253_v15 = vld [vmem:[%s1433_s2 + $0x10] sm:$0xff]  ;;  %v251_v16 = vld [vmem:[%s1433_s2] sm:$0xff]  ;;  %v252_v27 = vld [vmem:[%s1433_s2 + $0x8] sm:$0xff]  ;;  %s1080_s1 = scalar_lea.vmem %s834_s15, 16  ;;  %s1084_s16 = scalar_lea.vmem %s834_s15, 32 }
   0xc   :  { %176 = vperm.xlu1 %991, %v42_v6   ;;  %v377_v17 = vld [vmem:[%s1435_s4 + $0x30] sm:$0xff]  ;;  %v375_v18 = vld [vmem:[%s1435_s4 + $0x20] sm:$0xff]  ;;  %v378_v28 = vld [vmem:[%s1435_s4 + $0x38] sm:$0xff]  ;;  %v129_v48 = vsub.s32 1, %v84_v46  ;;  %v85_v50 = vsub.s32 0, %v84_v46  ;;  %v181_v53 = vsub.s32 2, %v84_v46  ;;  %p1081_p0 = scmp.ne.s32.totalorder %s834_s15, %s1080_s1  ;;  %p1085_p1 = scmp.lt.s32.totalorder %s834_s15, %s834_s15 }
   0xd   :  { %v257_v19 = vld [vmem:[%s1433_s2 + $0x30] sm:$0xff]  ;;  %v371_v21 = vld [vmem:[%s1435_s4] sm:$0xff]  ;;  %v376_v31 = vld [vmem:[%s1435_s4 + $0x28] sm:$0xff]  ;;  %v233_v54 = vsub.s32 3, %v84_v46  ;;  %p1086_p2 = scmp.lt.s32.totalorder %s1084_s16, %s1080_s1 }
   0xe   :  { %v373_v20 = vld [vmem:[%s1435_s4 + $0x10] sm:$0xff]  ;;  %v569_v23 = vld [vmem:[%s1437_s6 + $0x20] sm:$0xff]  ;;  %v374_v33 = vld [vmem:[%s1435_s4 + $0x18] sm:$0xff] }
   0xf   :  { %212 = vperm.xlu0 %1003, %v38_v4   ;;  %v571_v22 = vld [vmem:[%s1437_s6 + $0x30] sm:$0xff]  ;;  %v565_v26 = vld [vmem:[%s1437_s6] sm:$0xff]  ;;  %v372_v35 = vld [vmem:[%s1435_s4 + $0x8] sm:$0xff]  ;;  %p1087_p3 = por %p1086_p2, %p1085_p1 }
  0x10   :  { %992 = vset.pattern.permute.xlu1 %v1104_v5  ;;  %v567_v25 = vld [vmem:[%s1437_s6 + $0x10] sm:$0xff]  ;;  %v572_v38 = vld [vmem:[%s1437_s6 + $0x38] sm:$0xff]  ;;  %v570_v41 = vld [vmem:[%s1437_s6 + $0x28] sm:$0xff] }
  0x11   :  { %116 = vperm.xlu1 %992, %v40_v1   ;;  %v568_v45 = vld [vmem:[%s1437_s6 + $0x18] sm:$0xff]  ;;  %v566_v49 = vld [vmem:[%s1437_s6 + $0x8] sm:$0xff]  ;;  %v34_v52 = vld [vmem:[%s1431_s0] sm:$0xf]  ;;  %p1088_p4 = pnand %p1087_p3, %p1081_p0 }
  0x12   :  { %v1301_v56 = vrot.slane %v34_v52, %v129_v48  ;;  %v1303_v57 = vrot.slane %v34_v52, %v85_v50  ;;  %v1305_v58 = vrot.slane %v34_v52, %v181_v53  ;;  %v1307_v59 = vrot.slane %v34_v52, %v233_v54  ;;  %v363_v62 = vld [vmem:[%s1434_s3] sm:$0xff] }
  0x13   :  { %1008 = vset.pattern.permute.xlu0 %v1104_v5  ;;  %923 = vmatprep.mubr.msk.f32.mxu0 %vm419_vm0, %v363_v62 }
  0x14   :  { %124 = vperm.xlu0 %1008, %v42_v6  }
  0x15   :  { %993 = vset.pattern.permute.xlu1 %v1102_v2 }
  0x16   :  { %172 = vperm.xlu1 %993, %v41_v0  }
  0x18   :  { %108 = vperm.xlu0 %1008, %v38_v4  }
  0x1a   :  { %994 = vset.pattern.permute.xlu1 %v1103_v3 }
  0x1b   :  { %65 = vperm.xlu1 %994, %v39_v8  }
  0x1c   :  { %96 = vperm.xlu0 %1008, %v1185_v9  }
  0x1f   :  { %995 = vset.pattern.permute.xlu1 %v1104_v5 }
  0x20   :  { %112 = vperm.xlu1 %995, %v39_v8   ;;  %1010 = vset.pattern.permute.xlu0 %v1103_v3 }
  0x21   :  { %80 = vperm.xlu0 %1010, %v42_v6  }
  0x24   :  { %997 = vset.pattern.permute.xlu1 %v1105_v7 }
  0x25   :  { %224 = vperm.xlu1 %997, %v41_v0   ;;  %70 = vperm.xlu0 %1010, %v40_v1  }
  0x29   :  { %998 = vset.pattern.permute.xlu1 %v1103_v3  ;;  %296 = vperm.xlu0 %1010, %v258_v10  }
  0x2a   :  { %60 = vperm.xlu1 %998, %v38_v4  }
  0x2d   :  { %50 = vperm.xlu0 %1010, %v36_v11  }
  0x2e   :  { %999 = vset.pattern.permute.xlu1 %v1102_v2 }
  0x2f   :  { %164 = vperm.xlu1 %999, %v39_v8  }
  0x31   :  { %281 = vperm.xlu0 %1010, %v255_v12  }
  0x33   :  { %1000 = vset.pattern.permute.xlu1 %v1105_v7 }
  0x34   :  { %220 = vperm.xlu1 %1000, %v40_v1  }
  0x35   :  { %276 = vperm.xlu0 %1010, %v254_v13  }
  0x38   :  { %1001 = vset.pattern.permute.xlu1 %v1103_v3 }
  0x39   :  { %55 = vperm.xlu1 %1001, %v37_v14   ;;  %271 = vperm.xlu0 %1010, %v253_v15  }
  0x3d   :  { %1002 = vset.pattern.permute.xlu1 %v1104_v5  ;;  %261 = vperm.xlu0 %1010, %v251_v16  }
  0x3e   :  { %104 = vperm.xlu1 %1002, %v37_v14  }
  0x41   :  { %411 = vperm.xlu0 %1010, %v377_v17  }
  0x42   :  { %1004 = vset.pattern.permute.xlu1 %v1105_v7 }
  0x43   :  { %216 = vperm.xlu1 %1004, %v39_v8  }
  0x45   :  { %401 = vperm.xlu0 %1010, %v375_v18  }
  0x47   :  { %1005 = vset.pattern.permute.xlu1 %v1103_v3 }
  0x48   :  { %291 = vperm.xlu1 %1005, %v257_v19  }
  0x49   :  { %391 = vperm.xlu0 %1010, %v373_v20  }
  0x4c   :  { %1006 = vset.pattern.permute.xlu1 %v1104_v5 }
  0x4d   :  { %100 = vperm.xlu1 %1006, %v36_v11   ;;  %381 = vperm.xlu0 %1010, %v371_v21  }
  0x51   :  { %1007 = vset.pattern.permute.xlu1 %v1102_v2  ;;  %605 = vperm.xlu0 %1010, %v571_v22  }
  0x52   :  { %156 = vperm.xlu1 %1007, %v37_v14  }
  0x55   :  { %595 = vperm.xlu0 %1010, %v569_v23  }
  0x56   :  { %1009 = vset.pattern.permute.xlu1 %v1103_v3 }
  0x57   :  { %286 = vperm.xlu1 %1009, %v256_v24  }
  0x59   :  { %585 = vperm.xlu0 %1010, %v567_v25  }
  0x5b   :  { %45 = vperm.xlu1 %1009, %v1185_v9  }
  0x5d   :  { %575 = vperm.xlu0 %1010, %v565_v26  }
  0x5f   :  { %1011 = vset.pattern.permute.xlu1 %v1102_v2 }
  0x60   :  { %152 = vperm.xlu1 %1011, %v36_v11  }
  0x64   :  { %1012 = vset.pattern.permute.xlu1 %v1105_v7 }
  0x65   :  { %208 = vperm.xlu1 %1012, %v37_v14  }
  0x69   :  { %1013 = vset.pattern.permute.xlu1 %v1102_v2 }
  0x6a   :  { %148 = vperm.xlu1 %1013, %v1185_v9  }
  0x6e   :  { %1014 = vset.pattern.permute.xlu1 %v1105_v7 }
  0x6f   :  { %204 = vperm.xlu1 %1014, %v36_v11  }
  0x73   :  { %200 = vperm.xlu1 %1014, %v1185_v9  }
  0x77   :  { %1015 = vset.pattern.permute.xlu1 %v1103_v3 }
  0x78   :  { %266 = vperm.xlu1 %1015, %v252_v27  }
  0x7c   :  { %416 = vperm.xlu1 %1015, %v378_v28  }
  0x7d   :  { %v1267_v29 = vpop.permute.xlu1 %75  ;;  %v1269_v30 = vpop.permute.xlu0 %168 }
  0x7e   :  { %v93_v26 = vmul.f32 %v1303_v57, %v1267_v29  ;;  %v188_v52 = vmul.f32 %v1305_v58, %v1269_v30 }
  0x80   :  { %406 = vperm.xlu1 %1015, %v376_v31  }
  0x81   :  { %v161_v32 = vpop.permute.xlu0 %160 }
  0x82   :  { %v1277_v34 = vpop.permute.xlu1 %120  ;;  %v186_v12 = vmul.f32 %v1305_v58, %v161_v32 }
  0x83   :  { %v137_v25 = vmul.f32 %v1301_v56, %v1277_v34 }
  0x84   :  { %396 = vperm.xlu1 %1015, %v374_v33  }
  0x85   :  { %v145_v28 = vadd.f32 %v137_v25, %v93_v26 }
  0x86   :  { %v229_v36 = vpop.permute.xlu0 %228 }
  0x87   :  { %v177_v37 = vpop.permute.xlu1 %176  ;;  %v242_v2 = vmul.f32 %v1307_v59, %v229_v36 }
  0x88   :  { %386 = vperm.xlu1 %1015, %v372_v35   ;;  %v190_v1 = vmul.f32 %v1305_v58, %v177_v37 }
  0x8a   :  { %v213_v39 = vpop.permute.xlu0 %212 }
  0x8b   :  { %v238_v15 = vmul.f32 %v1307_v59, %v213_v39 }
  0x8c   :  { %v1285_v40 = vpop.permute.xlu1 %116  ;;  %610 = vperm.xlu1 %1015, %v572_v38  }
  0x8f   :  { %v125_v43 = vpop.permute.xlu0 %124 }
  0x90   :  { %600 = vperm.xlu1 %1015, %v570_v41   ;;  %v138_v60 = vmul.f32 %v1301_v56, %v125_v43 }
  0x91   :  { %v173_v44 = vpop.permute.xlu1 %172 }
  0x92   :  { %v189_v27 = vmul.f32 %v1305_v58, %v173_v44 }
  0x93   :  { %v109_v47 = vpop.permute.xlu0 %108 }
  0x94   :  { %590 = vperm.xlu1 %1015, %v568_v45   ;;  %v134_v8 = vmul.f32 %v1301_v56, %v109_v47  ;;  %v197_v33 = vadd.f32 %v189_v27, %v145_v28 }
  0x96   :  { %v66_v51 = vpop.permute.xlu1 %65 }
  0x97   :  { %v1299_v55 = vpop.permute.xlu0 %96  ;;  %v91_v37 = vmul.f32 %v1303_v57, %v66_v51  ;;  %v136_v51 = vmul.f32 %v1301_v56, %v1285_v40 }
  0x98   :  { %580 = vperm.xlu1 %1015, %v566_v49  }
  0x9b   :  { %v113_v61 = vpop.permute.xlu1 %112 }
  0x9c   :  { %v81_v63 = vpop.permute.xlu0 %80  ;;  %v135_v35 = vmul.f32 %v1301_v56, %v113_v61 }
  0x9d   :  { %v94_v0 = vmul.f32 %v1303_v57, %v81_v63 }
  0x9e   :  { %v143_v41 = vadd.f32 %v135_v35, %v91_v37  ;;  %v131_v37 = vmul.f32 %v1301_v56, %v1299_v55 }
  0x9f   :  { %v146_v3 = vadd.f32 %v138_v60, %v94_v0 }
  0xa0   :  { %v225_v4 = vpop.permute.xlu1 %224  ;;  %v71_v5 = vpop.permute.xlu0 %70 }
  0xa1   :  { %v198_v6 = vadd.f32 %v190_v1, %v146_v3  ;;  %v241_v31 = vmul.f32 %v1307_v59, %v225_v4  ;;  %v92_v47 = vmul.f32 %v1303_v57, %v71_v5 }
  0xa3   :  { %v250_v7 = vadd.f32 %v242_v2, %v198_v6  ;;  %v249_v39 = vadd.f32 %v241_v31, %v197_v33  ;;  %v144_v53 = vadd.f32 %v136_v51, %v92_v47 }
  0xa4   :  { %v297_v9 = vpop.permute.xlu0 %296 }
  0xa5   :  { %v306_v10 = vadd.f32 %v297_v9, %v250_v7  ;;  %v61_v11 = vpop.permute.xlu1 %60  ;;  %v196_v0 = vadd.f32 %v188_v52, %v144_v53 }
  0xa6   :  { %v90_v13 = vmul.f32 %v1303_v57, %v61_v11 }
  0xa7   :  { %v848_v14 = vmul.f32 -1.442695, %v306_v10 }
  0xa8   :  { %v142_v16 = vadd.f32 %v134_v8, %v90_v13  ;;  %v1328_v36 = vpop.permute.xlu0 %50 }
  0xa9   :  { %1016 = vpow2.f32 %v848_v14 }
  0xaa   :  { %v165_v17 = vpop.permute.xlu1 %164  ;;  %v194_v18 = vadd.f32 %v186_v12, %v142_v16 }
  0xab   :  { %v187_v38 = vmul.f32 %v1305_v58, %v165_v17 }
  0xac   :  { %v246_v19 = vadd.f32 %v238_v15, %v194_v18  ;;  %v282_v45 = vpop.permute.xlu0 %281 }
  0xad   :  { %v195_v44 = vadd.f32 %v187_v38, %v143_v41 }
  0xaf   :  { %v221_v20 = vpop.permute.xlu1 %220 }
  0xb0   :  { %v277_v54 = vpop.permute.xlu0 %276  ;;  %v240_v61 = vmul.f32 %v1307_v59, %v221_v20 }
  0xb1   :  { %v1341_v63 = vadd.f32 %v277_v54, %v246_v19 }
  0xb2   :  { %v248_v2 = vadd.f32 %v240_v61, %v196_v0 }
  0xb3   :  { %v844_v40 = vmul.f32 -1.442695, %v1341_v63 }
  0xb4   :  { %v56_v21 = vpop.permute.xlu1 %55  ;;  %v272_v19 = vpop.permute.xlu0 %271 }
  0xb6   :  { %v1017_v22 = vpop.eup %1016 }
  0xb7   :  { %v338_v23 = vadd.f32 1.0, %v1017_v22 }
  0xb9   :  { %1018 = vrcp.f32 %v338_v23  ;;  %v105_v24 = vpop.permute.xlu1 %104 }
  0xba   :  { %v133_v8 = vmul.f32 %v1301_v56, %v105_v24 }
  0xbe   :  { %v217_v32 = vpop.permute.xlu1 %216 }
  0xbf   :  { %v239_v29 = vmul.f32 %v1307_v59, %v217_v32  ;;  %v88_v32 = vmul.f32 %v1303_v57, %v1328_v36 }
  0xc1   :  { %v247_v49 = vadd.f32 %v239_v29, %v195_v44 }
  0xc3   :  { %v292_v34 = vpop.permute.xlu1 %291  ;;  %v1338_v60 = vadd.f32 %v282_v45, %v247_v49  ;;  %v262_v45 = vpop.permute.xlu0 %261 }
  0xc4   :  { %v305_v42 = vadd.f32 %v292_v34, %v249_v39 }
  0xc5   :  { %v845_v1 = vmul.f32 -1.442695, %v1338_v60 }
  0xc6   :  { %v1019_v43 = vpop.eup %1018  ;;  %v847_v46 = vmul.f32 -1.442695, %v305_v42 }
  0xc7   :  { %v362_v48 = vmul.f32 %v1019_v43, %v306_v10  ;;  %v89_v10 = vmul.f32 %v1303_v57, %v56_v21 }
  0xc8   :  { %1020 = vpow2.f32 %v847_v46  ;;  %v101_v50 = vpop.permute.xlu1 %100 }
  0xc9   :  { %907 = vmatprep.subr.mxu0 %v362_v48  ;;  %1022 = vpow2.f32 %v845_v1  ;;  %v141_v12 = vadd.f32 %v133_v8, %v89_v10  ;;  %v132_v33 = vmul.f32 %v1301_v56, %v101_v50  ;;  %v367_v8 = vld [vmem:[%s1434_s3 + $0x20] sm:$0xff]  ;;  %v369_v10 = vld [vmem:[%s1434_s3 + $0x30] sm:$0xff] }
  0xca   :  { %908 = vmatpush3.msra.mxu0 %v362_v48  ;;  %1024 = vpow2.f32 %v844_v40 }
  0xcb   :  { %v140_v41 = vadd.f32 %v132_v33, %v88_v32 }
  0xcd   :  { %v157_v62 = vpop.permute.xlu1 %156 }
  0xce   :  { %v185_v11 = vmul.f32 %v1305_v58, %v157_v62 }
  0xd0   :  { %v193_v15 = vadd.f32 %v185_v11, %v141_v12  ;;  %v370_v11 = vld [vmem:[%s1434_s3 + $0x38] sm:$0xff]  ;;  %v557_v12 = vld [vmem:[%s1436_s5] sm:$0xff] }
  0xd1   :  { %951 = vmatprep.mubr.msk.f32.mxu1 %vm419_vm0, %v557_v12 }
  0xd2   :  { %v287_v3 = vpop.permute.xlu1 %286 }
  0xd3   :  { %v304_v4 = vadd.f32 %v287_v3, %v248_v2 }
  0xd5   :  { %v1021_v5 = vpop.eup %1020  ;;  %v846_v30 = vmul.f32 -1.442695, %v304_v4 }
  0xd6   :  { %v337_v6 = vadd.f32 1.0, %v1021_v5  ;;  %v46_v7 = vpop.permute.xlu1 %45  ;;  %v1023_v14 = vpop.eup %1022 }
  0xd7   :  { %v1025_v18 = vpop.eup %1024  ;;  %v335_v20 = vadd.f32 1.0, %v1023_v14  ;;  %v87_v31 = vmul.f32 %v1303_v57, %v46_v7  ;;  %v366_v7 = vld [vmem:[%s1434_s3 + $0x18] sm:$0xff] }
  0xd8   :  { %1026 = vrcp.f32 %v337_v6  ;;  %v334_v27 = vadd.f32 1.0, %v1025_v18  ;;  %v365_v6 = vld [vmem:[%s1434_s3 + $0x10] sm:$0xff] }
  0xd9   :  { %1028 = vpow2.f32 %v846_v30  ;;  %v139_v34 = vadd.f32 %v131_v37, %v87_v31 }
  0xda   :  { %1030 = vrcp.f32 %v335_v20 }
  0xdb   :  { %v153_v9 = vpop.permute.xlu1 %152 }
  0xdc   :  { %v184_v39 = vmul.f32 %v1305_v58, %v153_v9  ;;  %v368_v9 = vld [vmem:[%s1434_s3 + $0x28] sm:$0xff] }
  0xde   :  { %v192_v36 = vadd.f32 %v184_v39, %v140_v41 }
  0xe0   :  { %v209_v13 = vpop.permute.xlu1 %208 }
  0xe1   :  { %v237_v16 = vmul.f32 %v1307_v59, %v209_v13 }
  0xe3   :  { %v245_v17 = vadd.f32 %v237_v16, %v193_v15 }
  0xe5   :  { %v1027_v22 = vpop.eup %1026  ;;  %v301_v23 = vadd.f32 %v272_v19, %v245_v17  ;;  %v149_v25 = vpop.permute.xlu1 %148 }
  0xe6   :  { %v1029_v26 = vpop.eup %1028  ;;  %v361_v24 = vmul.f32 %v1027_v22, %v305_v42  ;;  %v183_v38 = vmul.f32 %v1305_v58, %v149_v25  ;;  %v412_v17 = vpop.permute.xlu0 %411 }
  0xe7   :  { %v336_v28 = vadd.f32 1.0, %v1029_v26  ;;  %v843_v21 = vmul.f32 -1.442695, %v301_v23  ;;  %v1031_v56 = vpop.eup %1030 }
  0xe8   :  { %909 = vmatprep.subr.mxu0 %v361_v24  ;;  %v191_v43 = vadd.f32 %v183_v38, %v139_v34 }
  0xe9   :  { %1032 = vrcp.f32 %v336_v28  ;;  %910 = vmatpush3.msra.mxu0 %v361_v24 }
  0xea   :  { %1034 = vpow2.f32 %v843_v21  ;;  %v205_v35 = vpop.permute.xlu1 %204 }
  0xeb   :  { %1036 = vrcp.f32 %v334_v27  ;;  %v236_v29 = vmul.f32 %v1307_v59, %v205_v35 }
  0xed   :  { %v244_v46 = vadd.f32 %v236_v29, %v192_v36 }
  0xee   :  { %v201_v42 = vpop.permute.xlu1 %200 }
  0xef   :  { %v235_v57 = vmul.f32 %v1307_v59, %v201_v42  ;;  %v359_v59 = vmul.f32 %v1031_v56, %v1338_v60  ;;  %v562_v56 = vld [vmem:[%s1436_s5 + $0x28] sm:$0xff] }
  0xf1   :  { %v243_v44 = vadd.f32 %v235_v57, %v191_v43 }
  0xf3   :  { %v299_v47 = vadd.f32 %v262_v45, %v243_v44  ;;  %v267_v48 = vpop.permute.xlu1 %266 }
  0xf4   :  { %v300_v55 = vadd.f32 %v267_v48, %v244_v46  ;;  %v558_v46 = vld [vmem:[%s1436_s5 + $0x8] sm:$0xff]  ;;  %v560_v48 = vld [vmem:[%s1436_s5 + $0x18] sm:$0xff] }
  0xf5   :  { %v841_v49 = vmul.f32 -1.442695, %v299_v47 }
  0xf6   :  { %v1033_v50 = vpop.eup %1032  ;;  %v842_v51 = vmul.f32 -1.442695, %v300_v55 }
  0xf7   :  { %v1035_v58 = vpop.eup %1034  ;;  %v360_v52 = vmul.f32 %v1033_v50, %v304_v4  ;;  %1038 = vpow2.f32 %v841_v49  ;;  %v417_v15 = vpop.permute.xlu1 %416  ;;  %v563_v49 = vld [vmem:[%s1436_s5 + $0x30] sm:$0xff]  ;;  %v564_v50 = vld [vmem:[%s1436_s5 + $0x38] sm:$0xff] }
  0xf8   :  { %v1037_v53 = vpop.eup %1036  ;;  %v333_v54 = vadd.f32 1.0, %v1035_v58  ;;  %1040 = vpow2.f32 %v842_v51  ;;  %v1106_v51 = vmov 0.0  }
  0xf9   :  { %911 = vmatprep.subr.mxu0 %v360_v52  ;;  %v358_v61 = vmul.f32 %v1037_v53, %v1341_v63  ;;  %v364_v63 = vld [vmem:[%s1434_s3 + $0x8] sm:$0xff] }
  0xfa   :  { %1042 = vrcp.f32 %v333_v54  ;;  %912 = vmatpush3.msra.mxu0 %v360_v52 }
  0xfb   :  { %913 = vmatprep.subr.mxu0 %v359_v59  ;;  %v407_v20 = vpop.permute.xlu1 %406 }
  0xfc   :  { %914 = vmatpush3.msra.mxu0 %v359_v59 }
  0xfd   :  { %915 = vmatprep.subr.mxu0 %v358_v61 }
  0xfe   :  { %916 = vmatpush3.msra.mxu0 %v358_v61 }
  0xff   :  { %v397_v21 = vpop.permute.xlu1 %396 }
 0x103   :  { %v387_v37 = vpop.permute.xlu1 %386 }
 0x104   :  { %v1039_v62 = vpop.eup %1038 }
 0x105   :  { %v1041_v0 = vpop.eup %1040  ;;  %v331_v1 = vadd.f32 1.0, %v1039_v62 }
 0x106   :  { %v332_v2 = vadd.f32 1.0, %v1041_v0 }
 0x107   :  { %v1043_v3 = vpop.eup %1042  ;;  %1044 = vrcp.f32 %v331_v1  ;;  %v611_v53 = vpop.permute.xlu1 %610 }
 0x108   :  { %1046 = vrcp.f32 %v332_v2  ;;  %v357_v40 = vmul.f32 %v1043_v3, %v301_v23  ;;  %v402_v23 = vpop.permute.xlu0 %401 }
 0x10a   :  { %917 = vmatprep.subr.mxu0 %v357_v40 }
 0x10b   :  { %918 = vmatpush3.msra.mxu0 %v357_v40  ;;  %v601_v0 = vpop.permute.xlu1 %600 }
 0x10c   :  { %v392_v32 = vpop.permute.xlu0 %391 }
 0x110   :  { %v382_v39 = vpop.permute.xlu0 %381 }
 0x114   :  { %v1045_v4 = vpop.eup %1044  ;;  %v606_v59 = vpop.permute.xlu0 %605 }
 0x115   :  { %v1047_v60 = vpop.eup %1046  ;;  %v355_v30 = vmul.f32 %v1045_v4, %v299_v47  ;;  %v559_v47 = vld [vmem:[%s1436_s5 + $0x10] sm:$0xff] }
 0x116   :  { %v356_v5 = vmul.f32 %v1047_v60, %v300_v55  ;;  %v561_v55 = vld [vmem:[%s1436_s5 + $0x20] sm:$0xff] }
 0x118   :  { %919 = vmatprep.subr.mxu0 %v356_v5  ;;  %v596_v2 = vpop.permute.xlu0 %595 }
 0x119   :  { %920 = vmatpush3.msra.mxu0 %v356_v5 }
 0x11a   :  { %921 = vmatprep.subr.mxu0 %v355_v30 }
 0x11b   :  { %922 = vmatpush3.msra.mxu0 %v355_v30  ;;  %v591_v30 = vpop.permute.xlu1 %590 }
 0x11c   :  { %924 = vmatmul.mubr.msk.f32.vlgmr.msra.gmra.mxu0 %vm419_vm0, %v364_v63  ;;  %963 = vmatprep.subr.mxu0 %v1106_v51 }
 0x11d   :  { %926 = vmatprep.mubr.msk.f32.mxu0 %vm419_vm0, %v365_v6  ;;  %v586_v6 = vpop.permute.xlu0 %585 }
 0x120   :  { %927 = vmatmul.mubr.msk.f32.gmra.mxu0 %vm419_vm0, %v366_v7 }
 0x121   :  { %929 = vmatprep.mubr.msk.f32.mxu0 %vm419_vm0, %v367_v8 }
 0x124   :  { %930 = vmatmul.mubr.msk.f32.gmra.mxu0 %vm419_vm0, %v368_v9  ;;  %v581_v9 = vpop.permute.xlu1 %580 }
 0x125   :  { %932 = vmatprep.mubr.msk.f32.mxu0 %vm419_vm0, %v369_v10 }
 0x128   :  { %933 = vmatmul.mubr.msk.f32.gmra.mxu0 %vm419_vm0, %v370_v11  ;;  %v576_v11 = vpop.permute.xlu0 %575 }
 0x129   :  { %979 = vmatprep.mubr.msk.f32.mxu0 %vm1107_vm1, %v1106_v51 }
 0x1dc   :  { %v925_v13 = vpop.f32.mrf.mxu0 }
 0x1dd   :  { %v516_v38 = vadd.f32 %v925_v13, %v387_v37 }
 0x1de   :  { %v510_v14 = vpop.f32.mrf.mxu0 }
 0x1df   :  { %v511_v34 = vadd.f32 %v510_v14, %v382_v39 }
 0x1e0   :  { %v928_v16 = vpop.f32.mrf.mxu0 }
 0x1e1   :  { %v526_v33 = vadd.f32 %v928_v16, %v397_v21 }
 0x1e2   :  { %v520_v18 = vpop.f32.mrf.mxu0 }
 0x1e3   :  { %v521_v35 = vadd.f32 %v520_v18, %v392_v32 }
 0x1e4   :  { %v931_v19 = vpop.f32.mrf.mxu0 }
 0x1e5   :  { %v536_v27 = vadd.f32 %v931_v19, %v407_v20  ;;  %v750_v20 = vld [vmem:[%s1438_s7] sm:$0x1] }
 0x1e6   :  { %v530_v22 = vpop.f32.mrf.mxu0 }
 0x1e7   :  { %v531_v31 = vadd.f32 %v530_v22, %v402_v23  ;;  %v752_v23 = vstv %s1439_s8 }
 0x1e8   :  { %v934_v25 = vpop.f32.mrf.mxu0 }
 0x1e9   :  { %v546_v26 = vadd.f32 %v934_v25, %v417_v15 }
 0x1ea   :  { %v540_v24 = vpop.f32.mrf.mxu0 }
 0x1eb   :  { %1048 = vtanh.f32 %v546_v26  ;;  %v541_v28 = vadd.f32 %v540_v24, %v412_v17 }
 0x1ed   :  { %1050 = vtanh.f32 %v541_v28 }
 0x1ee   :  { %1052 = vtanh.f32 %v536_v27 }
 0x1ef   :  { %1054 = vtanh.f32 %v531_v31 }
 0x1f0   :  { %1056 = vtanh.f32 %v526_v33 }
 0x1f1   :  { %1058 = vtanh.f32 %v521_v35 }
 0x1f2   :  { %1060 = vtanh.f32 %v516_v38 }
 0x1f3   :  { %1062 = vtanh.f32 %v511_v34 }
 0x1f8   :  { %v1049_v41 = vpop.eup %1048 }
 0x1f9   :  { %935 = vmatprep.subr.mxu1 %v1049_v41 }
 0x1fa   :  { %v1051_v29 = vpop.eup %1050  ;;  %936 = vmatpush3.msra.mxu1 %v1049_v41 }
 0x1fb   :  { %937 = vmatprep.subr.mxu1 %v1051_v29  ;;  %v1053_v42 = vpop.eup %1052 }
 0x1fc   :  { %938 = vmatpush3.msra.mxu1 %v1051_v29  ;;  %v1055_v43 = vpop.eup %1054 }
 0x1fd   :  { %939 = vmatprep.subr.mxu1 %v1053_v42  ;;  %v1057_v57 = vpop.eup %1056 }
 0x1fe   :  { %940 = vmatpush3.msra.mxu1 %v1053_v42  ;;  %v1059_v36 = vpop.eup %1058 }
 0x1ff   :  { %941 = vmatprep.subr.mxu1 %v1055_v43  ;;  %v1061_v44 = vpop.eup %1060 }
 0x200   :  { %942 = vmatpush3.msra.mxu1 %v1055_v43  ;;  %v1063_v45 = vpop.eup %1062 }
 0x201   :  { %943 = vmatprep.subr.mxu1 %v1057_v57 }
 0x202   :  { %944 = vmatpush3.msra.mxu1 %v1057_v57 }
 0x203   :  { %945 = vmatprep.subr.mxu1 %v1059_v36 }
 0x204   :  { %946 = vmatpush3.msra.mxu1 %v1059_v36 }
 0x205   :  { %947 = vmatprep.subr.mxu1 %v1061_v44 }
 0x206   :  { %948 = vmatpush3.msra.mxu1 %v1061_v44 }
 0x207   :  { %949 = vmatprep.subr.mxu1 %v1063_v45 }
 0x208   :  { %950 = vmatpush3.msra.mxu1 %v1063_v45 }
 0x209   :  { %952 = vmatmul.mubr.msk.f32.vlgmr.msra.gmra.mxu1 %vm419_vm0, %v558_v46 }
 0x20a   :  { %954 = vmatprep.mubr.msk.f32.mxu1 %vm419_vm0, %v559_v47 }
 0x20d   :  { %955 = vmatmul.mubr.msk.f32.gmra.mxu1 %vm419_vm0, %v560_v48 }
 0x20e   :  { %957 = vmatprep.mubr.msk.f32.mxu1 %vm419_vm0, %v561_v55 }
 0x211   :  { %958 = vmatmul.mubr.msk.f32.gmra.mxu1 %vm419_vm0, %v562_v56 }
 0x212   :  { %960 = vmatprep.mubr.msk.f32.mxu1 %vm419_vm0, %v563_v49 }
 0x215   :  { %961 = vmatmul.mubr.msk.f32.gmra.mxu1 %vm419_vm0, %v564_v50 }
 0x2c9   :  { %v953_v58 = vpop.f32.mrf.mxu1 }
 0x2ca   :  { %v709_v10 = vadd.f32 %v953_v58, %v581_v9 }
 0x2cb   :  { %v703_v52 = vpop.f32.mrf.mxu1 }
 0x2cc   :  { %v704_v12 = vadd.f32 %v703_v52, %v576_v11 }
 0x2cd   :  { %v956_v54 = vpop.f32.mrf.mxu1 }
 0x2ce   :  { %v719_v7 = vadd.f32 %v956_v54, %v591_v30 }
 0x2cf   :  { %v713_v61 = vpop.f32.mrf.mxu1 }
 0x2d0   :  { %v714_v8 = vadd.f32 %v713_v61, %v586_v6 }
 0x2d1   :  { %v959_v62 = vpop.f32.mrf.mxu1 }
 0x2d2   :  { %v729_v60 = vadd.f32 %v959_v62, %v601_v0 }
 0x2d3   :  { %v723_v1 = vpop.f32.mrf.mxu1 }
 0x2d4   :  { %v724_v63 = vadd.f32 %v723_v1, %v596_v2 }
 0x2d5   :  { %v962_v3 = vpop.f32.mrf.mxu1 }
 0x2d6   :  { %v739_v40 = vadd.f32 %v962_v3, %v611_v53 }
 0x2d7   :  { %v733_v4 = vpop.f32.mrf.mxu1 }
 0x2d8   :  { %1064 = vtanh.f32 %v739_v40  ;;  %v734_v5 = vadd.f32 %v733_v4, %v606_v59 }
 0x2da   :  { %1066 = vtanh.f32 %v734_v5 }
 0x2db   :  { %1068 = vtanh.f32 %v729_v60 }
 0x2dc   :  { %1070 = vtanh.f32 %v724_v63 }
 0x2dd   :  { %1072 = vtanh.f32 %v719_v7 }
 0x2de   :  { %1074 = vtanh.f32 %v714_v8 }
 0x2df   :  { %1076 = vtanh.f32 %v709_v10 }
 0x2e0   :  { %1078 = vtanh.f32 %v704_v12 }
 0x2e5   :  { %v1065_v13 = vpop.eup %1064 }
 0x2e6   :  { %964 = vmatpush3.msra.mxu0 %v1065_v13 }
 0x2e7   :  { %v1067_v14 = vpop.eup %1066  ;;  %965 = vmatprep.subr.mxu0 %v1106_v51 }
 0x2e8   :  { %966 = vmatpush3.msra.mxu0 %v1067_v14  ;;  %v1069_v15 = vpop.eup %1068 }
 0x2e9   :  { %967 = vmatprep.subr.mxu0 %v1106_v51  ;;  %v1071_v16 = vpop.eup %1070 }
 0x2ea   :  { %968 = vmatpush3.msra.mxu0 %v1069_v15  ;;  %v1073_v17 = vpop.eup %1072 }
 0x2eb   :  { %969 = vmatprep.subr.mxu0 %v1106_v51  ;;  %v1075_v18 = vpop.eup %1074 }
 0x2ec   :  { %970 = vmatpush3.msra.mxu0 %v1071_v16  ;;  %v1077_v19 = vpop.eup %1076 }
 0x2ed   :  { %971 = vmatprep.subr.mxu0 %v1106_v51  ;;  %v1079_v22 = vpop.eup %1078 }
 0x2ee   :  { %972 = vmatpush3.msra.mxu0 %v1073_v17 }
 0x2ef   :  { %973 = vmatprep.subr.mxu0 %v1106_v51 }
 0x2f0   :  { %974 = vmatpush3.msra.mxu0 %v1075_v18 }
 0x2f1   :  { %975 = vmatprep.subr.mxu0 %v1106_v51 }
 0x2f2   :  { %976 = vmatpush3.msra.mxu0 %v1077_v19 }
 0x2f3   :  { %977 = vmatprep.subr.mxu0 %v1106_v51 }
 0x2f4   :  { %978 = vmatpush3.msra.mxu0 %v1079_v22 }
 0x2f5   :  { %980 = vmatmul.mubr.msk.f32.vlgmr.msra.gmra.mxu0 %vm419_vm0, %v750_v20 }
 0x3b5   :  { %v822_v25 = vpop.f32.mrf.mxu0 }
 0x3b6   :  { %v823_v26 = vadd.f32 %v822_v25, %v752_v23 }
 0x3b7   :  { %v981_v24 = vpop.f32.mrf.mxu0 }
 0x3b8   :  { %826 = vst [vmem:[#allocation3] sm:$0x1] %v823_v26 }
 0x3b9   :  { %1091 = shalt.err (!%p1088_p4)
}
 0x3ba   :  { %836 = dma.vmem_to_hbm [thread:$0]  %s834_s15, 16, %s1440_s9, [#allocation4]  }
 0x3bb   :  { %1100 = dma.done.wait [#allocation4], 16  }
 0x3bc   :  { %1101 = vsyncadd [#allocation4], 4294967280 }
 0x3bd   :  { %840 = vsyncpa [#allocation4], 1 }

</bundles_post_ra>
